<compile_context>
chip_gen: v5e
topology: v5e:2x2
jax: 0.10.0
libtpu: 0.0.40
codegen_flags: <defaults>
</compile_context>

<pallas_src>
import jax
import jax.numpy as jnp
from jax.experimental import pallas as pl
from jax.experimental.pallas import tpu as pltpu


def actor_kernel(x_ref, w1_ref, b1_ref, w2_ref, b2_ref,
                 w3_ref, b3_ref, w4_ref, b4_ref, out_ref):
    # Layer 1: (TB, n_obs) @ (n_obs, 512) -> relu
    h = jnp.dot(x_ref[...], w1_ref[...], preferred_element_type=jnp.float32)
    h = jnp.maximum(h + b1_ref[...], 0.0)
    # Layer 2: (TB, 512) @ (512, 256) -> relu
    h = jnp.dot(h, w2_ref[...], preferred_element_type=jnp.float32)
    h = jnp.maximum(h + b2_ref[...], 0.0)
    # Layer 3: (TB, 256) @ (256, 128) -> relu
    h = jnp.dot(h, w3_ref[...], preferred_element_type=jnp.float32)
    h = jnp.maximum(h + b3_ref[...], 0.0)
    # Layer 4: (TB, 128) @ (128, A_pad) -> tanh (EUP)
    z = jnp.dot(h, w4_ref[...], preferred_element_type=jnp.float32)
    out_ref[...] = jnp.tanh(z + b4_ref[...])


def _round_up(v, m):
    return ((v + m - 1) // m) * m


def actor_forward(x, params, *, tile_b=256):
    """x: (B, n_obs) float32 -> (B, action_dim) float32."""
    w1, b1, w2, b2, w3, b3, w4, b4 = params
    x = x.astype(jnp.float32)
    B, n_obs = x.shape
    action_dim = w4.shape[1]

    # Lane-dense output: pad the last layer's out-features to a multiple of 128
    # so the kernel emits unmasked full-lane stores. tanh(0 + 0) = 0 in padded
    # columns; they are sliced away below.
    A_pad = _round_up(max(action_dim, 128), 128)
    if A_pad != action_dim:
        w4 = jnp.pad(w4, ((0, 0), (0, A_pad - action_dim)))
        b4 = jnp.pad(b4, ((0, 0), (0, A_pad - action_dim)))

    # Batch tile: multiple of 8 (f32 sublane), capped at tile_b.
    TB = min(tile_b, max(8, _round_up(B, 8)))
    Bp = _round_up(B, TB)
    if Bp != B:
        x = jnp.pad(x, ((0, Bp - B), (0, 0)))  # pad batch to a tile multiple

    batch_map = lambda i: (i, 0)   # activation / output tiles advance with the grid
    const_map = lambda i: (0, 0)   # weights & biases stay VMEM-resident

    out = pl.pallas_call(
        actor_kernel,
        out_shape=jax.ShapeDtypeStruct((Bp, A_pad), jnp.float32),
        grid_spec=pltpu.PrefetchScalarGridSpec(
            num_scalar_prefetch=0,
            grid=(Bp // TB,),
            in_specs=[
                pl.BlockSpec((TB, n_obs), batch_map),
                pl.BlockSpec(w1.shape, const_map),
                pl.BlockSpec(b1.shape, const_map),
                pl.BlockSpec(w2.shape, const_map),
                pl.BlockSpec(b2.shape, const_map),
                pl.BlockSpec(w3.shape, const_map),
                pl.BlockSpec(b3.shape, const_map),
                pl.BlockSpec(w4.shape, const_map),
                pl.BlockSpec(b4.shape, const_map),
            ],
            out_specs=pl.BlockSpec((TB, A_pad), batch_map),
        ),
        compiler_params=pltpu.CompilerParams(
            dimension_semantics=("parallel",)),   # 2-TC sharding on v7x
    )(x, w1, b1, w2, b2, w3, b3, w4, b4)
    return out[:B, :action_dim]


def init_actor_params(n_observations, action_dim, seed=1111):
    """Deterministic init mimicking nn.Linear's U(-1/sqrt(fan_in), 1/sqrt(fan_in)).

    Weights stored pre-transposed as (in_features, out_features); biases as
    (1, out_features) for TPU layout.
    """
    key = jax.random.PRNGKey(seed)
    keys = jax.random.split(key, 8)
    dims = [n_observations, 512, 256, 128, action_dim]
    params = []
    for li in range(4):
        fan_in, fan_out = dims[li], dims[li + 1]
        lim = 1.0 / jnp.sqrt(jnp.float32(fan_in))
        w = jax.random.uniform(keys[2 * li], (fan_in, fan_out), jnp.float32, -lim, lim)
        b = jax.random.uniform(keys[2 * li + 1], (1, fan_out), jnp.float32, -lim, lim)
        params.extend([w, b])
    return tuple(params)


def actor_reference(x, params):
    """Pure-JAX reference of the PyTorch forward for a correctness check."""
    w1, b1, w2, b2, w3, b3, w4, b4 = params
    h = jax.nn.relu(x @ w1 + b1)
    h = jax.nn.relu(h @ w2 + b2)
    h = jax.nn.relu(h @ w3 + b3)
    return jnp.tanh(h @ w4 + b4)


if __name__ == "__main__":
    n_observations = 24
    action_dim = 8
    batch = 8

    params = init_actor_params(n_observations, action_dim)

    key = jax.random.PRNGKey(0)
    x = jax.random.normal(key, (batch, n_observations), jnp.float32)

    a = actor_forward(x, params)
    a = jax.block_until_ready(a)

    a_ref = actor_reference(x, params)
    assert a.shape == (batch, action_dim)
    assert bool(jnp.all(jnp.abs(a) <= 1.0 + 1e-6)), "tanh range violated"
    assert jnp.allclose(a, a_ref, atol=1e-3, rtol=1e-3), "mismatch vs reference"

    print("KERNEL_OK")
</pallas_src>

<mosaic_0001>
module attributes {stable_mosaic.version = 11 : i64} {
  func.func @actor_kernel(%arg0: i32, %arg1: memref<8x24xf32, #tpu.memory_space<vmem>>, %arg2: memref<24x512xf32, #tpu.memory_space<vmem>>, %arg3: memref<1x512xf32, #tpu.memory_space<vmem>>, %arg4: memref<512x256xf32, #tpu.memory_space<vmem>>, %arg5: memref<1x256xf32, #tpu.memory_space<vmem>>, %arg6: memref<256x128xf32, #tpu.memory_space<vmem>>, %arg7: memref<1x128xf32, #tpu.memory_space<vmem>>, %arg8: memref<128x128xf32, #tpu.memory_space<vmem>>, %arg9: memref<1x128xf32, #tpu.memory_space<vmem>>, %arg10: memref<8x128xf32, #tpu.memory_space<vmem>>) attributes {dimension_semantics = [#tpu.dimension_semantics<parallel>], iteration_bounds = array<i64: 1>, scalar_prefetch = 0 : i64, scratch_operands = 0 : i64, tpu.core_type = #tpu.core_type<tc>, window_params = [{transform_indices = @transform_0, window_bounds = array<i64: 8, 24>}, {pipeline_mode = #tpu.pipeline_mode<synchronous>, transform_indices = @transform_1, window_bounds = array<i64: 24, 512>}, {pipeline_mode = #tpu.pipeline_mode<synchronous>, transform_indices = @transform_2, window_bounds = array<i64: 1, 512>}, {pipeline_mode = #tpu.pipeline_mode<synchronous>, transform_indices = @transform_3, window_bounds = array<i64: 512, 256>}, {pipeline_mode = #tpu.pipeline_mode<synchronous>, transform_indices = @transform_4, window_bounds = array<i64: 1, 256>}, {pipeline_mode = #tpu.pipeline_mode<synchronous>, transform_indices = @transform_5, window_bounds = array<i64: 256, 128>}, {pipeline_mode = #tpu.pipeline_mode<synchronous>, transform_indices = @transform_6, window_bounds = array<i64: 1, 128>}, {pipeline_mode = #tpu.pipeline_mode<synchronous>, transform_indices = @transform_7, window_bounds = array<i64: 128, 128>}, {pipeline_mode = #tpu.pipeline_mode<synchronous>, transform_indices = @transform_8, window_bounds = array<i64: 1, 128>}, {transform_indices = @transform_9, window_bounds = array<i64: 8, 128>}]} {
    %c0 = arith.constant 0 : index
    %c0_0 = arith.constant 0 : index
    %0 = vector.load %arg1[%c0, %c0_0] : memref<8x24xf32, #tpu.memory_space<vmem>>, vector<8x24xf32>
    %c0_1 = arith.constant 0 : index
    %c0_2 = arith.constant 0 : index
    %1 = vector.load %arg2[%c0_1, %c0_2] : memref<24x512xf32, #tpu.memory_space<vmem>>, vector<24x512xf32>
    %cst = arith.constant dense<0.000000e+00> : vector<8x512xf32>
    %2 = tpu.matmul %0, %1, %cst {dimension_numbers = #tpu.dot_dimension_numbers<[1], [0], [0], [1], [0, 0, 1, 1], [], []>} : vector<8x24xf32>, vector<24x512xf32>, vector<8x512xf32> -> vector<8x512xf32>
    %c0_3 = arith.constant 0 : index
    %c0_4 = arith.constant 0 : index
    %3 = vector.load %arg3[%c0_3, %c0_4] : memref<1x512xf32, #tpu.memory_space<vmem>>, vector<1x512xf32>
    %4 = vector.broadcast %3 : vector<1x512xf32> to vector<8x512xf32>
    %5 = arith.addf %2, %4 : vector<8x512xf32>
    %cst_5 = arith.constant 0.000000e+00 : f32
    %6 = vector.broadcast %cst_5 : f32 to vector<8x512xf32>
    %7 = arith.maximumf %5, %6 : vector<8x512xf32>
    %c0_6 = arith.constant 0 : index
    %c0_7 = arith.constant 0 : index
    %8 = vector.load %arg4[%c0_6, %c0_7] : memref<512x256xf32, #tpu.memory_space<vmem>>, vector<512x256xf32>
    %cst_8 = arith.constant dense<0.000000e+00> : vector<8x256xf32>
    %9 = tpu.matmul %7, %8, %cst_8 {dimension_numbers = #tpu.dot_dimension_numbers<[1], [0], [0], [1], [0, 0, 1, 1], [], []>} : vector<8x512xf32>, vector<512x256xf32>, vector<8x256xf32> -> vector<8x256xf32>
    %c0_9 = arith.constant 0 : index
    %c0_10 = arith.constant 0 : index
    %10 = vector.load %arg5[%c0_9, %c0_10] : memref<1x256xf32, #tpu.memory_space<vmem>>, vector<1x256xf32>
    %11 = vector.broadcast %10 : vector<1x256xf32> to vector<8x256xf32>
    %12 = arith.addf %9, %11 : vector<8x256xf32>
    %cst_11 = arith.constant 0.000000e+00 : f32
    %13 = vector.broadcast %cst_11 : f32 to vector<8x256xf32>
    %14 = arith.maximumf %12, %13 : vector<8x256xf32>
    %c0_12 = arith.constant 0 : index
    %c0_13 = arith.constant 0 : index
    %15 = vector.load %arg6[%c0_12, %c0_13] : memref<256x128xf32, #tpu.memory_space<vmem>>, vector<256x128xf32>
    %cst_14 = arith.constant dense<0.000000e+00> : vector<8x128xf32>
    %16 = tpu.matmul %14, %15, %cst_14 {dimension_numbers = #tpu.dot_dimension_numbers<[1], [0], [0], [1], [0, 0, 1, 1], [], []>} : vector<8x256xf32>, vector<256x128xf32>, vector<8x128xf32> -> vector<8x128xf32>
    %c0_15 = arith.constant 0 : index
    %c0_16 = arith.constant 0 : index
    %17 = vector.load %arg7[%c0_15, %c0_16] : memref<1x128xf32, #tpu.memory_space<vmem>>, vector<1x128xf32>
    %18 = vector.broadcast %17 : vector<1x128xf32> to vector<8x128xf32>
    %19 = arith.addf %16, %18 : vector<8x128xf32>
    %cst_17 = arith.constant 0.000000e+00 : f32
    %20 = vector.broadcast %cst_17 : f32 to vector<8x128xf32>
    %21 = arith.maximumf %19, %20 : vector<8x128xf32>
    %c0_18 = arith.constant 0 : index
    %c0_19 = arith.constant 0 : index
    %22 = vector.load %arg8[%c0_18, %c0_19] : memref<128x128xf32, #tpu.memory_space<vmem>>, vector<128x128xf32>
    %cst_20 = arith.constant dense<0.000000e+00> : vector<8x128xf32>
    %23 = tpu.matmul %21, %22, %cst_20 {dimension_numbers = #tpu.dot_dimension_numbers<[1], [0], [0], [1], [0, 0, 1, 1], [], []>} : vector<8x128xf32>, vector<128x128xf32>, vector<8x128xf32> -> vector<8x128xf32>
    %c0_21 = arith.constant 0 : index
    %c0_22 = arith.constant 0 : index
    %24 = vector.load %arg9[%c0_21, %c0_22] : memref<1x128xf32, #tpu.memory_space<vmem>>, vector<1x128xf32>
    %25 = vector.broadcast %24 : vector<1x128xf32> to vector<8x128xf32>
    %26 = arith.addf %23, %25 : vector<8x128xf32>
    %27 = math.tanh %26 : vector<8x128xf32>
    %c0_23 = arith.constant 0 : index
    %c0_24 = arith.constant 0 : index
    %28 = vector.load %arg10[%c0_23, %c0_24] : memref<8x128xf32, #tpu.memory_space<vmem>>, vector<8x128xf32>
    tpu.vector_store %arg10[%c0_23, %c0_24], %27 {strides = array<i32>} : memref<8x128xf32, #tpu.memory_space<vmem>>, vector<8x128xf32>,
    return
  }
  func.func @transform_0(%arg0: i32) -> (i32, i32) {
    %c0_i32 = arith.constant 0 : i32
    %c0_i32_0 = arith.constant 0 : i32
    return %arg0, %c0_i32 : i32, i32
  }
  func.func @transform_1(%arg0: i32) -> (i32, i32) {
    %c0_i32 = arith.constant 0 : i32
    %c0_i32_0 = arith.constant 0 : i32
    %c0_i32_1 = arith.constant 0 : i32
    return %c0_i32, %c0_i32_0 : i32, i32
  }
  func.func @transform_2(%arg0: i32) -> (i32, i32) {
    %c0_i32 = arith.constant 0 : i32
    %c0_i32_0 = arith.constant 0 : i32
    %c0_i32_1 = arith.constant 0 : i32
    return %c0_i32, %c0_i32_0 : i32, i32
  }
  func.func @transform_3(%arg0: i32) -> (i32, i32) {
    %c0_i32 = arith.constant 0 : i32
    %c0_i32_0 = arith.constant 0 : i32
    %c0_i32_1 = arith.constant 0 : i32
    return %c0_i32, %c0_i32_0 : i32, i32
  }
  func.func @transform_4(%arg0: i32) -> (i32, i32) {
    %c0_i32 = arith.constant 0 : i32
    %c0_i32_0 = arith.constant 0 : i32
    %c0_i32_1 = arith.constant 0 : i32
    return %c0_i32, %c0_i32_0 : i32, i32
  }
  func.func @transform_5(%arg0: i32) -> (i32, i32) {
    %c0_i32 = arith.constant 0 : i32
    %c0_i32_0 = arith.constant 0 : i32
    %c0_i32_1 = arith.constant 0 : i32
    return %c0_i32, %c0_i32_0 : i32, i32
  }
  func.func @transform_6(%arg0: i32) -> (i32, i32) {
    %c0_i32 = arith.constant 0 : i32
    %c0_i32_0 = arith.constant 0 : i32
    %c0_i32_1 = arith.constant 0 : i32
    return %c0_i32, %c0_i32_0 : i32, i32
  }
  func.func @transform_7(%arg0: i32) -> (i32, i32) {
    %c0_i32 = arith.constant 0 : i32
    %c0_i32_0 = arith.constant 0 : i32
    %c0_i32_1 = arith.constant 0 : i32
    return %c0_i32, %c0_i32_0 : i32, i32
  }
  func.func @transform_8(%arg0: i32) -> (i32, i32) {
    %c0_i32 = arith.constant 0 : i32
    %c0_i32_0 = arith.constant 0 : i32
    %c0_i32_1 = arith.constant 0 : i32
    return %c0_i32, %c0_i32_0 : i32, i32
  }
  func.func @transform_9(%arg0: i32) -> (i32, i32) {
    %c0_i32 = arith.constant 0 : i32
    %c0_i32_0 = arith.constant 0 : i32
    return %arg0, %c0_i32 : i32, i32
  }
}

</mosaic_0001>

<bundles_post_ra>
// kernel: tpu_custom_call.1
= control target key start
LH: loop header
LB: loop body
LE: loop exit
PB: predicated region body
PF: predicated region fallthrough
CT: control target
= control target key end

     0   :  { %14 = vsyncpa [#allocation3], 0  ;;  %s971_s0 = inlined_call_operand.hbm [shape: f32[8,24], index: 0, kind: input, shape index: {}]   ;;  %s972_s1 = inlined_call_operand.hbm [shape: f32[24,512], index: 1, kind: input, shape index: {}]   ;;  %s973_s2 = inlined_call_operand.hbm [shape: f32[1,512], index: 2, kind: input, shape index: {}]   ;;  %s974_s3 = inlined_call_operand.hbm [shape: f32[512,256], index: 3, kind: input, shape index: {}]   ;;  %s975_s4 = inlined_call_operand.vmem [shape: f32[1,256], index: 4, kind: input, shape index: {}]   ;;  %s976_s5 = inlined_call_operand.hbm [shape: f32[256,128], index: 5, kind: input, shape index: {}]   ;;  %s977_s6 = inlined_call_operand.vmem [shape: f32[1,128], index: 6, kind: input, shape index: {}]   ;;  %s978_s7 = inlined_call_operand.hbm [shape: f32[128,128], index: 7, kind: input, shape index: {}]   ;;  %s979_s8 = inlined_call_operand.vmem [shape: f32[1,128], index: 8, kind: input, shape index: {}]   ;;  %s980_s9 = inlined_call_operand.hbm [shape: f32[8,128], index: 9, kind: output, shape index: {}]  }
   0x1   :  { %15 = vsyncpa [#allocation6], 0 }
   0x2   :  { %16 = vsyncpa [#allocation9], 0 }
   0x3   :  { %17 = vsyncpa [#allocation12], 0  ;;  %s34_s11 = sshll.u32 %s972_s1, 4  ;;  %s35_s11 = int_to_ptr.hbm [resolvable:$true] %s34_s11 }
   0x4   :  { %18 = vsyncpa [#allocation4], 0  ;;  %s868_s12 = smov [#allocation5]   ;;  %s58_s16 = sshll.u32 %s974_s3, 4  ;;  %s59_s16 = int_to_ptr.hbm [resolvable:$true] %s58_s16 }
   0x5   :  { %s36_s13 = sshll.u32 %s868_s12, 4  ;;  %s869_s17 = smov 512   ;;  %s37_s13 = int_to_ptr.vmem [resolvable:$true] %s36_s13 }
   0x6   :  { %s870_s18 = smov 32   ;;  %s871_s19 = smov [#allocation8]  }
   0x7   :  { %42 = dma.hbm_to_vmem [thread:$0]  %s35_s11, 1536, %s37_s13, [#allocation6], %s869_s17, %s869_s17, %s870_s18  }
   0x8   :  { %s60_s20 = sshll.u32 %s871_s19, 4  ;;  %s872_s21 = smov 256   ;;  %s61_s20 = int_to_ptr.vmem [resolvable:$true] %s60_s20 }
   0x9   :  { %s873_s22 = smov 16   ;;  %s24_s24 = sshll.u32 %s971_s0, 4  ;;  %s25_s24 = int_to_ptr.hbm [resolvable:$true] %s24_s24 }
   0xa   :  { %66 = dma.hbm_to_vmem [thread:$0]  %s59_s16, 16384, %s61_s20, [#allocation9], %s872_s21, %s872_s21, %s873_s22  }
   0xb   :  { %s874_s25 = smov [#allocation2]   ;;  %s48_s28 = sshll.u32 %s973_s2, 4  ;;  %s49_s28 = int_to_ptr.hbm [resolvable:$true] %s48_s28 }
   0xc   :  { %s26_s26 = sshll.u32 %s874_s25, 4  ;;  %s875_s29 = smov [#allocation7]   ;;  %s27_s26 = int_to_ptr.vmem [resolvable:$true] %s26_s26 }
   0xd   :  { %29 = dma.hbm_to_vmem [thread:$0]  %s25_s24, 128, %s27_s26, [#allocation3]  }
   0xe   :  { %s50_s30 = sshll.u32 %s875_s29, 4  ;;  %s73_s12 = sshll.u32 %s976_s5, 4  ;;  %s51_s30 = int_to_ptr.vmem [resolvable:$true] %s50_s30  ;;  %s74_s12 = int_to_ptr.hbm [resolvable:$true] %s73_s12 }
   0xf   :  { %53 = dma.hbm_to_vmem [thread:$0]  %s49_s28, 64, %s51_s30, [#allocation6]  }
  0x10   :  { %s876_s0 = smov [#allocation10]   ;;  %s88_s16 = sshll.u32 %s978_s7, 4  ;;  %s89_s16 = int_to_ptr.hbm [resolvable:$true] %s88_s16 }
  0x11   :  { %s75_s13 = sshll.u32 %s876_s0, 4  ;;  %s877_s17 = smov 128   ;;  %s76_s13 = int_to_ptr.vmem [resolvable:$true] %s75_s13 }
  0x12   :  { %s878_s2 = smov 8   ;;  %s879_s18 = smov [#allocation11]  }
  0x13   :  { %81 = dma.hbm_to_vmem [thread:$0]  %s74_s12, 4096, %s76_s13, [#allocation9], %s877_s17, %s877_s17, %s878_s2  }
  0x14   :  { %s90_s19 = sshll.u32 %s879_s18, 4  ;;  %s91_s19 = int_to_ptr.vmem [resolvable:$true] %s90_s19 }
  0x15   :  { %96 = dma.hbm_to_vmem [thread:$0]  %s89_s16, 2048, %s91_s19, [#allocation12], %s877_s17, %s877_s17, %s878_s2  }
  0x16   :  { %858 = dma.done.wait [#allocation3], 128  }
  0x17   :  { %859 = vsyncadd [#allocation3], 4294967168 }
  0x18   :  { %860 = dma.done.wait [#allocation6], 1600  }
  0x19   :  { %861 = vsyncadd [#allocation6], 4294965696 }
  0x1a   :  { %862 = dma.done.wait [#allocation9], 20480  }
  0x1b   :  { %863 = vsyncadd [#allocation9], 4294946816 }
  0x1c   :  { %864 = dma.done.wait [#allocation12], 2048  }
  0x1d   :  { %865 = vsyncadd [#allocation12], 4294965248  ;;  %v132_v0 = vld [vmem:[#allocation5 + $0x40] sm:$0xff]  ;;  %v949_v3 = vld [vmem:[#allocation2] sm:$0xff]  ;;  %vm146_vm0 = vcmask 195584   ;;  %s880_s1 = smov [#allocation13]  }
  0x1e   :  { %v128_v1 = vld [vmem:[#allocation5 + $0x20] sm:$0xff]  ;;  %163 = vmatpush.msra.mxu3 %v132_v0  ;;  %v133_v4 = vld [vmem:[#allocation5 + $0x48] sm:$0xff]  ;;  %v264_v5 = vld [vmem:[#allocation8 + $0xf0] sm:$0xff]  ;;  %s654_s23 = sshll.u32 %s880_s1, 4  ;;  %s656_s26 = sshll.u32 %s980_s9, 4  ;;  %s655_s23 = int_to_ptr.vmem [resolvable:$true] %s654_s23  ;;  %s657_s26 = int_to_ptr.hbm [resolvable:$true] %s656_s26 }
  0x1f   :  { %v124_v2 = vld [vmem:[#allocation5] sm:$0xff]  ;;  %368 = vmatpush.msra.mxu0 %v264_v5  ;;  %v129_v7 = vld [vmem:[#allocation5 + $0x28] sm:$0xff]  ;;  %v260_v8 = vld [vmem:[#allocation8 + $0xd0] sm:$0xff] }
  0x20   :  { %164 = vmatpush.msra.mxu3 %v128_v1  ;;  %v262_v6 = vld [vmem:[#allocation8 + $0xe0] sm:$0xff]  ;;  %v296_v9 = vld [vmem:[#allocation8 + $0x1f0] sm:$0xff]  ;;  %v265_v59 = vld [vmem:[#allocation8 + $0xf8] sm:$0xff] }
  0x21   :  { %369 = vmatpush.msra.mxu0 %v262_v6  ;;  %v294_v10 = vld [vmem:[#allocation8 + $0x1e0] sm:$0xff]  ;;  %388 = vmatpush.msra.mxu1 %v296_v9  ;;  %v134_v13 = vld [vmem:[#allocation5 + $0x50] sm:$0xff]  ;;  %v135_v25 = vld [vmem:[#allocation5 + $0x58] sm:$0xff] }
  0x22   :  { %165 = vmatpush.msra.mxu3 %v124_v2  ;;  %v125_v11 = vld [vmem:[#allocation5 + $0x8] sm:$0xff]  ;;  %v292_v14 = vld [vmem:[#allocation8 + $0x1d0] sm:$0xff] }
  0x23   :  { %669 = vmatmul.msk.f32.vlgmr.msra.gmra.mxu3 %vm146_vm0, %v949_v3  ;;  %v258_v12 = vld [vmem:[#allocation8 + $0xc0] sm:$0xff]  ;;  %370 = vmatpush.msra.mxu0 %v260_v8  ;;  %v328_v15 = vld [vmem:[#allocation8 + $0x2f0] sm:$0xff]  ;;  %v263_v63 = vld [vmem:[#allocation8 + $0xe8] sm:$0xff] }
  0x24   :  { %183 = vmatpush.msrb.mxu3 %v133_v4  ;;  %v256_v16 = vld [vmem:[#allocation8 + $0xb0] sm:$0xff]  ;;  %389 = vmatpush.msra.mxu1 %v294_v10  ;;  %v326_v17 = vld [vmem:[#allocation8 + $0x2e0] sm:$0xff]  ;;  %v297_v4 = vld [vmem:[#allocation8 + $0x1f8] sm:$0xff] }
  0x25   :  { %408 = vmatpush.msra.mxu2 %v328_v15  ;;  %371 = vmatpush.msra.mxu0 %v258_v12  ;;  %v290_v18 = vld [vmem:[#allocation8 + $0x1c0] sm:$0xff]  ;;  %v130_v19 = vld [vmem:[#allocation5 + $0x30] sm:$0xff]  ;;  %v131_v29 = vld [vmem:[#allocation5 + $0x38] sm:$0xff] }
  0x26   :  { %184 = vmatpush.msrb.mxu3 %v129_v7  ;;  %v254_v20 = vld [vmem:[#allocation8 + $0xa0] sm:$0xff]  ;;  %390 = vmatpush.msra.mxu1 %v292_v14  ;;  %v288_v21 = vld [vmem:[#allocation8 + $0x1b0] sm:$0xff]  ;;  %v259_v7 = vld [vmem:[#allocation8 + $0xc8] sm:$0xff] }
  0x27   :  { %372 = vmatpush.msra.mxu0 %v256_v16  ;;  %409 = vmatpush.msra.mxu2 %v326_v17  ;;  %v324_v22 = vld [vmem:[#allocation8 + $0x2d0] sm:$0xff]  ;;  %v286_v26 = vld [vmem:[#allocation8 + $0x1a0] sm:$0xff]  ;;  %v295_v8 = vld [vmem:[#allocation8 + $0x1e8] sm:$0xff] }
  0x28   :  { %185 = vmatpush.msrb.mxu3 %v125_v11  ;;  %v126_v23 = vld [vmem:[#allocation5 + $0x10] sm:$0xff]  ;;  %391 = vmatpush.msra.mxu1 %v290_v18  ;;  %v250_v27 = vld [vmem:[#allocation8 + $0x80] sm:$0xff]  ;;  %v127_v34 = vld [vmem:[#allocation5 + $0x18] sm:$0xff] }
  0x29   :  { %v252_v24 = vld [vmem:[#allocation8 + $0x90] sm:$0xff]  ;;  %373 = vmatpush.msra.mxu0 %v254_v20  ;;  %410 = vmatpush.msra.mxu2 %v324_v22  ;;  %v322_v28 = vld [vmem:[#allocation8 + $0x2c0] sm:$0xff]  ;;  %v257_v11 = vld [vmem:[#allocation8 + $0xb8] sm:$0xff] }
  0x2a   :  { %203 = vmatpush.msra.mxu3 %v134_v13  ;;  %392 = vmatpush.msra.mxu1 %v288_v21  ;;  %v284_v30 = vld [vmem:[#allocation8 + $0x190] sm:$0xff]  ;;  %v282_v33 = vld [vmem:[#allocation8 + $0x180] sm:$0xff]  ;;  %v293_v12 = vld [vmem:[#allocation8 + $0x1d8] sm:$0xff] }
  0x2b   :  { %670 = vmatmul.msk.f32.vlgmr.msrb.gmra.mxu3 %vm146_vm0, %v949_v3  ;;  %374 = vmatpush.msra.mxu0 %v252_v24  ;;  %v248_v31 = vld [vmem:[#allocation8 + $0x70] sm:$0xff]  ;;  %v246_v35 = vld [vmem:[#allocation8 + $0x60] sm:$0xff]  ;;  %v255_v15 = vld [vmem:[#allocation8 + $0xa8] sm:$0xff] }
  0x2c   :  { %204 = vmatpush.msra.mxu3 %v130_v19  ;;  %393 = vmatpush.msra.mxu1 %v286_v26  ;;  %v320_v32 = vld [vmem:[#allocation8 + $0x2b0] sm:$0xff]  ;;  %v318_v39 = vld [vmem:[#allocation8 + $0x2a0] sm:$0xff]  ;;  %v291_v16 = vld [vmem:[#allocation8 + $0x1c8] sm:$0xff] }
  0x2d   :  { %375 = vmatpush.msra.mxu0 %v250_v27  ;;  %411 = vmatpush.msra.mxu2 %v322_v28  ;;  %v280_v36 = vld [vmem:[#allocation8 + $0x170] sm:$0xff]  ;;  %v278_v40 = vld [vmem:[#allocation8 + $0x160] sm:$0xff]  ;;  %v253_v19 = vld [vmem:[#allocation8 + $0x98] sm:$0xff] }
  0x2e   :  { %205 = vmatpush.msra.mxu3 %v126_v23  ;;  %394 = vmatpush.msra.mxu1 %v284_v30  ;;  %v360_v37 = vld [vmem:[#allocation8 + $0x3f0] sm:$0xff]  ;;  %v358_v41 = vld [vmem:[#allocation8 + $0x3e0] sm:$0xff]  ;;  %v289_v20 = vld [vmem:[#allocation8 + $0x1b8] sm:$0xff] }
  0x2f   :  { %376 = vmatpush.msra.mxu0 %v248_v31  ;;  %412 = vmatpush.msra.mxu2 %v320_v32  ;;  %v244_v38 = vld [vmem:[#allocation8 + $0x50] sm:$0xff]  ;;  %v242_v42 = vld [vmem:[#allocation8 + $0x40] sm:$0xff]  ;;  %v329_v21 = vld [vmem:[#allocation8 + $0x2f8] sm:$0xff] }
  0x30   :  { %223 = vmatpush.msrb.mxu3 %v135_v25  ;;  %395 = vmatpush.msra.mxu1 %v282_v33  ;;  %v316_v43 = vld [vmem:[#allocation8 + $0x290] sm:$0xff]  ;;  %v314_v47 = vld [vmem:[#allocation8 + $0x280] sm:$0xff]  ;;  %v251_v23 = vld [vmem:[#allocation8 + $0x88] sm:$0xff] }
  0x31   :  { %377 = vmatpush.msra.mxu0 %v246_v35  ;;  %413 = vmatpush.msra.mxu2 %v318_v39  ;;  %v276_v44 = vld [vmem:[#allocation8 + $0x150] sm:$0xff]  ;;  %v274_v48 = vld [vmem:[#allocation8 + $0x140] sm:$0xff]  ;;  %v249_v24 = vld [vmem:[#allocation8 + $0x78] sm:$0xff] }
  0x32   :  { %224 = vmatpush.msrb.mxu3 %v131_v29  ;;  %396 = vmatpush.msra.mxu1 %v280_v36  ;;  %v356_v45 = vld [vmem:[#allocation8 + $0x3d0] sm:$0xff]  ;;  %v238_v49 = vld [vmem:[#allocation8 + $0x20] sm:$0xff]  ;;  %v247_v25 = vld [vmem:[#allocation8 + $0x68] sm:$0xff] }
  0x33   :  { %671 = vmatmul.msk.f32.vlgmr.msra.gmra.mxu3 %vm146_vm0, %v949_v3  ;;  %378 = vmatpush.msra.mxu0 %v244_v38  ;;  %v240_v46 = vld [vmem:[#allocation8 + $0x30] sm:$0xff]  ;;  %v354_v50 = vld [vmem:[#allocation8 + $0x3c0] sm:$0xff]  ;;  %v287_v26 = vld [vmem:[#allocation8 + $0x1a8] sm:$0xff] }
  0x34   :  { %225 = vmatpush.msrb.mxu3 %v127_v34  ;;  %397 = vmatpush.msra.mxu1 %v278_v40  ;;  %v236_v51 = vld [vmem:[#allocation8 + $0x10] sm:$0xff]  ;;  %v270_v55 = vld [vmem:[#allocation8 + $0x120] sm:$0xff]  ;;  %v327_v27 = vld [vmem:[#allocation8 + $0x2e8] sm:$0xff] }
  0x35   :  { %379 = vmatpush.msra.mxu0 %v242_v42  ;;  %414 = vmatpush.msra.mxu2 %v316_v43  ;;  %v272_v52 = vld [vmem:[#allocation8 + $0x130] sm:$0xff]  ;;  %v310_v56 = vld [vmem:[#allocation8 + $0x260] sm:$0xff]  ;;  %v245_v29 = vld [vmem:[#allocation8 + $0x58] sm:$0xff] }
  0x36   :  { %428 = vmatpush.msra.mxu3 %v360_v37  ;;  %398 = vmatpush.msra.mxu1 %v276_v44  ;;  %v312_v53 = vld [vmem:[#allocation8 + $0x270] sm:$0xff]  ;;  %v234_v57 = vld [vmem:[#allocation8] sm:$0xff]  ;;  %v285_v30 = vld [vmem:[#allocation8 + $0x198] sm:$0xff] }
  0x37   :  { %380 = vmatpush.msra.mxu0 %v240_v46  ;;  %415 = vmatpush.msra.mxu2 %v314_v47  ;;  %v352_v54 = vld [vmem:[#allocation8 + $0x3b0] sm:$0xff]  ;;  %v350_v58 = vld [vmem:[#allocation8 + $0x3a0] sm:$0xff]  ;;  %v325_v31 = vld [vmem:[#allocation8 + $0x2d8] sm:$0xff] }
  0x38   :  { %429 = vmatpush.msra.mxu3 %v358_v41  ;;  %399 = vmatpush.msra.mxu1 %v274_v48  ;;  %v268_v60 = vld [vmem:[#allocation8 + $0x110] sm:$0xff]  ;;  %v266_v0 = vld [vmem:[#allocation8 + $0x100] sm:$0xff]  ;;  %v243_v33 = vld [vmem:[#allocation8 + $0x48] sm:$0xff] }
  0x39   :  { %381 = vmatpush.msra.mxu0 %v238_v49  ;;  %416 = vmatpush.msra.mxu2 %v312_v53  ;;  %v308_v61 = vld [vmem:[#allocation8 + $0x250] sm:$0xff]  ;;  %v306_v1 = vld [vmem:[#allocation8 + $0x240] sm:$0xff]  ;;  %v283_v34 = vld [vmem:[#allocation8 + $0x188] sm:$0xff] }
  0x3a   :  { %430 = vmatpush.msra.mxu3 %v356_v45  ;;  %400 = vmatpush.msra.mxu1 %v272_v52  ;;  %v348_v62 = vld [vmem:[#allocation8 + $0x390] sm:$0xff]  ;;  %v346_v2 = vld [vmem:[#allocation8 + $0x380] sm:$0xff]  ;;  %v323_v35 = vld [vmem:[#allocation8 + $0x2c8] sm:$0xff] }
  0x3b   :  { %672 = vmatmul.msk.f32.vlgmr.msrb.gmra.mxu3 %vm146_vm0, %v949_v3  ;;  %382 = vmatpush.msra.mxu0 %v236_v51  ;;  %v261_v3 = vld [vmem:[#allocation8 + $0xd8] sm:$0xff]  ;;  %v304_v5 = vld [vmem:[#allocation8 + $0x230] sm:$0xff]  ;;  %v302_v9 = vld [vmem:[#allocation8 + $0x220] sm:$0xff] }
  0x3c   :  { %431 = vmatpush.msra.mxu3 %v354_v50  ;;  %401 = vmatpush.msra.mxu1 %v270_v55  ;;  %v344_v6 = vld [vmem:[#allocation8 + $0x370] sm:$0xff]  ;;  %v342_v10 = vld [vmem:[#allocation8 + $0x360] sm:$0xff]  ;;  %v241_v37 = vld [vmem:[#allocation8 + $0x38] sm:$0xff] }
  0x3d   :  { %417 = vmatpush.msra.mxu2 %v310_v56  ;;  %383 = vmatpush.msra.mxu0 %v234_v57  ;;  %v300_v13 = vld [vmem:[#allocation8 + $0x210] sm:$0xff]  ;;  %v298_v17 = vld [vmem:[#allocation8 + $0x200] sm:$0xff]  ;;  %v281_v38 = vld [vmem:[#allocation8 + $0x178] sm:$0xff] }
  0x3e   :  { %432 = vmatpush.msra.mxu3 %v352_v54  ;;  %402 = vmatpush.msra.mxu1 %v268_v60  ;;  %v340_v14 = vld [vmem:[#allocation8 + $0x350] sm:$0xff]  ;;  %v338_v18 = vld [vmem:[#allocation8 + $0x340] sm:$0xff]  ;;  %v321_v39 = vld [vmem:[#allocation8 + $0x2b8] sm:$0xff] }
  0x3f   :  { %448 = vmatpush.msrb.mxu0 %v265_v59  ;;  %418 = vmatpush.msra.mxu2 %v308_v61  ;;  %v336_v22 = vld [vmem:[#allocation8 + $0x330] sm:$0xff]  ;;  %v334_v28 = vld [vmem:[#allocation8 + $0x320] sm:$0xff]  ;;  %v361_v40 = vld [vmem:[#allocation8 + $0x3f8] sm:$0xff] }
  0x40   :  { %433 = vmatpush.msra.mxu3 %v350_v58  ;;  %403 = vmatpush.msra.mxu1 %v266_v0  ;;  %v332_v32 = vld [vmem:[#allocation8 + $0x310] sm:$0xff]  ;;  %v330_v36 = vld [vmem:[#allocation8 + $0x300] sm:$0xff]  ;;  %v239_v41 = vld [vmem:[#allocation8 + $0x28] sm:$0xff] }
  0x41   :  { %449 = vmatpush.msrb.mxu0 %v263_v63  ;;  %419 = vmatpush.msra.mxu2 %v306_v1  ;;  %v279_v42 = vld [vmem:[#allocation8 + $0x168] sm:$0xff]  ;;  %v237_v45 = vld [vmem:[#allocation8 + $0x18] sm:$0xff] }
  0x42   :  { %434 = vmatpush.msra.mxu3 %v348_v62  ;;  %468 = vmatpush.msrb.mxu1 %v297_v4  ;;  %v319_v43 = vld [vmem:[#allocation8 + $0x2a8] sm:$0xff]  ;;  %v277_v46 = vld [vmem:[#allocation8 + $0x158] sm:$0xff] }
  0x43   :  { %450 = vmatpush.msrb.mxu0 %v261_v3  ;;  %420 = vmatpush.msra.mxu2 %v304_v5  ;;  %v359_v44 = vld [vmem:[#allocation8 + $0x3e8] sm:$0xff]  ;;  %v317_v47 = vld [vmem:[#allocation8 + $0x298] sm:$0xff] }
  0x44   :  { %435 = vmatpush.msra.mxu3 %v346_v2  ;;  %469 = vmatpush.msrb.mxu1 %v295_v8  ;;  %v357_v48 = vld [vmem:[#allocation8 + $0x3d8] sm:$0xff]  ;;  %v235_v49 = vld [vmem:[#allocation8 + $0x8] sm:$0xff] }
  0x45   :  { %451 = vmatpush.msrb.mxu0 %v259_v7  ;;  %421 = vmatpush.msra.mxu2 %v302_v9  ;;  %v275_v50 = vld [vmem:[#allocation8 + $0x148] sm:$0xff]  ;;  %v273_v53 = vld [vmem:[#allocation8 + $0x138] sm:$0xff] }
  0x46   :  { %436 = vmatpush.msra.mxu3 %v344_v6  ;;  %470 = vmatpush.msrb.mxu1 %v293_v12  ;;  %v315_v51 = vld [vmem:[#allocation8 + $0x288] sm:$0xff]  ;;  %v313_v54 = vld [vmem:[#allocation8 + $0x278] sm:$0xff] }
  0x47   :  { %452 = vmatpush.msrb.mxu0 %v257_v11  ;;  %422 = vmatpush.msra.mxu2 %v300_v13  ;;  %v355_v52 = vld [vmem:[#allocation8 + $0x3c8] sm:$0xff]  ;;  %v353_v55 = vld [vmem:[#allocation8 + $0x3b8] sm:$0xff] }
  0x48   :  { %437 = vmatpush.msra.mxu3 %v342_v10  ;;  %471 = vmatpush.msrb.mxu1 %v291_v16  ;;  %v271_v56 = vld [vmem:[#allocation8 + $0x128] sm:$0xff]  ;;  %v269_v59 = vld [vmem:[#allocation8 + $0x118] sm:$0xff] }
  0x49   :  { %453 = vmatpush.msrb.mxu0 %v255_v15  ;;  %423 = vmatpush.msra.mxu2 %v298_v17  ;;  %v311_v57 = vld [vmem:[#allocation8 + $0x268] sm:$0xff]  ;;  %v309_v60 = vld [vmem:[#allocation8 + $0x258] sm:$0xff] }
  0x4a   :  { %438 = vmatpush.msra.mxu3 %v340_v14  ;;  %472 = vmatpush.msrb.mxu1 %v289_v20  ;;  %v351_v58 = vld [vmem:[#allocation8 + $0x3a8] sm:$0xff]  ;;  %v349_v61 = vld [vmem:[#allocation8 + $0x398] sm:$0xff] }
  0x4b   :  { %454 = vmatpush.msrb.mxu0 %v253_v19  ;;  %488 = vmatpush.msrb.mxu2 %v329_v21  ;;  %v267_v62 = vld [vmem:[#allocation8 + $0x108] sm:$0xff]  ;;  %v305_v1 = vld [vmem:[#allocation8 + $0x238] sm:$0xff] }
  0x4c   :  { %439 = vmatpush.msra.mxu3 %v338_v18  ;;  %473 = vmatpush.msrb.mxu1 %v287_v26  ;;  %v307_v63 = vld [vmem:[#allocation8 + $0x248] sm:$0xff]  ;;  %v345_v2 = vld [vmem:[#allocation8 + $0x378] sm:$0xff] }
  0x4d   :  { %455 = vmatpush.msrb.mxu0 %v251_v23  ;;  %489 = vmatpush.msrb.mxu2 %v327_v27  ;;  %v347_v0 = vld [vmem:[#allocation8 + $0x388] sm:$0xff]  ;;  %v301_v5 = vld [vmem:[#allocation8 + $0x218] sm:$0xff] }
  0x4e   :  { %440 = vmatpush.msra.mxu3 %v336_v22  ;;  %474 = vmatpush.msrb.mxu1 %v285_v30  ;;  %v303_v3 = vld [vmem:[#allocation8 + $0x228] sm:$0xff]  ;;  %v341_v6 = vld [vmem:[#allocation8 + $0x358] sm:$0xff] }
  0x4f   :  { %456 = vmatpush.msrb.mxu0 %v249_v24  ;;  %490 = vmatpush.msrb.mxu2 %v325_v31  ;;  %v343_v4 = vld [vmem:[#allocation8 + $0x368] sm:$0xff]  ;;  %v136_v7 = vld [vmem:[#allocation7] sm:$0xf]  ;;  %v544_v31 = vld [vmem:[#allocation10 + $0x70] sm:$0xff] }
  0x50   :  { %441 = vmatpush.msra.mxu3 %v334_v28  ;;  %475 = vmatpush.msrb.mxu1 %v283_v34  ;;  %v299_v8 = vld [vmem:[#allocation8 + $0x208] sm:$0xff]  ;;  %v138_v10 = vperm.slane %v136_v7, 0  ;;  %v337_v11 = vld [vmem:[#allocation8 + $0x338] sm:$0xff]  ;;  %v139_v18 = vperm.slane %v136_v7, 1  ;;  %v140_v22 = vperm.slane %v136_v7, 2  ;;  %v141_v26 = vperm.slane %v136_v7, 3 }
  0x51   :  { %457 = vmatpush.msrb.mxu0 %v247_v25  ;;  %491 = vmatpush.msrb.mxu2 %v323_v35  ;;  %v339_v9 = vld [vmem:[#allocation8 + $0x348] sm:$0xff]  ;;  %v333_v14 = vld [vmem:[#allocation8 + $0x318] sm:$0xff] }
  0x52   :  { %442 = vmatpush.msra.mxu3 %v332_v32  ;;  %476 = vmatpush.msrb.mxu1 %v281_v38  ;;  %v335_v12 = vld [vmem:[#allocation8 + $0x328] sm:$0xff]  ;;  %v545_v30 = vld [vmem:[#allocation10 + $0x78] sm:$0xff] }
  0x53   :  { %458 = vmatpush.msrb.mxu0 %v245_v29  ;;  %492 = vmatpush.msrb.mxu2 %v321_v39  ;;  %v331_v16 = vld [vmem:[#allocation8 + $0x308] sm:$0xff]  ;;  %v541_v34 = vld [vmem:[#allocation10 + $0x58] sm:$0xff] }
  0x54   :  { %443 = vmatpush.msra.mxu3 %v330_v36  ;;  %477 = vmatpush.msrb.mxu1 %v279_v42  ;;  %v543_v32 = vld [vmem:[#allocation10 + $0x68] sm:$0xff]  ;;  %v561_v35 = vld [vmem:[#allocation10 + $0xf8] sm:$0xff]  ;;  %v560_v36 = vld [vmem:[#allocation10 + $0xf0] sm:$0xff] }
  0x55   :  { %459 = vmatpush.msrb.mxu0 %v243_v33  ;;  %493 = vmatpush.msrb.mxu2 %v319_v43  ;;  %v542_v33 = vld [vmem:[#allocation10 + $0x60] sm:$0xff]  ;;  %v539_v38 = vld [vmem:[#allocation10 + $0x48] sm:$0xff]  ;;  %v537_v42 = vld [vmem:[#allocation10 + $0x38] sm:$0xff] }
  0x56   :  { %508 = vmatpush.msrb.mxu3 %v361_v40  ;;  %478 = vmatpush.msrb.mxu1 %v277_v46  ;;  %v559_v39 = vld [vmem:[#allocation10 + $0xe8] sm:$0xff]  ;;  %v538_v40 = vld [vmem:[#allocation10 + $0x40] sm:$0xff]  ;;  %v557_v43 = vld [vmem:[#allocation10 + $0xd8] sm:$0xff] }
  0x57   :  { %460 = vmatpush.msrb.mxu0 %v241_v37  ;;  %494 = vmatpush.msrb.mxu2 %v317_v47  ;;  %v540_v37 = vld [vmem:[#allocation10 + $0x50] sm:$0xff]  ;;  %v535_v46 = vld [vmem:[#allocation10 + $0x28] sm:$0xff] }
  0x58   :  { %509 = vmatpush.msrb.mxu3 %v359_v44  ;;  %479 = vmatpush.msrb.mxu1 %v275_v50  ;;  %v536_v44 = vld [vmem:[#allocation10 + $0x30] sm:$0xff]  ;;  %v555_v47 = vld [vmem:[#allocation10 + $0xc8] sm:$0xff]  ;;  %v533_v50 = vld [vmem:[#allocation10 + $0x18] sm:$0xff] }
  0x59   :  { %461 = vmatpush.msrb.mxu0 %v239_v41  ;;  %495 = vmatpush.msrb.mxu2 %v315_v51  ;;  %v558_v41 = vld [vmem:[#allocation10 + $0xe0] sm:$0xff]  ;;  %v553_v51 = vld [vmem:[#allocation10 + $0xb8] sm:$0xff]  ;;  %v616_v7 = vld [vmem:[#allocation11 + $0x48] sm:$0xff] }
  0x5a   :  { %510 = vmatpush.msrb.mxu3 %v357_v48  ;;  %480 = vmatpush.msrb.mxu1 %v273_v53  ;;  %v534_v48 = vld [vmem:[#allocation10 + $0x20] sm:$0xff]  ;;  %v552_v53 = vld [vmem:[#allocation10 + $0xb0] sm:$0xff] }
  0x5b   :  { %462 = vmatpush.msrb.mxu0 %v237_v45  ;;  %496 = vmatpush.msrb.mxu2 %v313_v54  ;;  %v556_v45 = vld [vmem:[#allocation10 + $0xd0] sm:$0xff]  ;;  %v531_v54 = vld [vmem:[#allocation10 + $0x8] sm:$0xff] }
  0x5c   :  { %511 = vmatpush.msrb.mxu3 %v355_v52  ;;  %481 = vmatpush.msrb.mxu1 %v271_v56  ;;  %v532_v52 = vld [vmem:[#allocation10 + $0x10] sm:$0xff]  ;;  %v530_v56 = vld [vmem:[#allocation10] sm:$0xff] }
  0x5d   :  { %463 = vmatpush.msrb.mxu0 %v235_v49  ;;  %497 = vmatpush.msrb.mxu2 %v311_v57  ;;  %v554_v49 = vld [vmem:[#allocation10 + $0xc0] sm:$0xff] }
  0x5e   :  { %512 = vmatpush.msrb.mxu3 %v353_v55  ;;  %482 = vmatpush.msrb.mxu1 %v269_v59  ;;  %v551_v55 = vld [vmem:[#allocation10 + $0xa8] sm:$0xff]  ;;  %v550_v57 = vld [vmem:[#allocation10 + $0xa0] sm:$0xff]  ;;  %v548_v59 = vld [vmem:[#allocation10 + $0x90] sm:$0xff] }
  0x5f   :  { %498 = vmatpush.msrb.mxu2 %v309_v60  ;;  %v547_v60 = vld [vmem:[#allocation10 + $0x88] sm:$0xff] }
  0x60   :  { %513 = vmatpush.msrb.mxu3 %v351_v58  ;;  %483 = vmatpush.msrb.mxu1 %v267_v62  ;;  %v549_v58 = vld [vmem:[#allocation10 + $0x98] sm:$0xff] }
  0x61   :  { %499 = vmatpush.msrb.mxu2 %v307_v63  ;;  %v622_v62 = vld [vmem:[#allocation11 + $0x78] sm:$0xff]  ;;  %v621_v63 = vld [vmem:[#allocation11 + $0x70] sm:$0xff] }
  0x62   :  { %514 = vmatpush.msrb.mxu3 %v349_v61  ;;  %v546_v61 = vld [vmem:[#allocation10 + $0x80] sm:$0xff] }
  0x63   :  { %500 = vmatpush.msrb.mxu2 %v305_v1  ;;  %v619_v1 = vld [vmem:[#allocation11 + $0x60] sm:$0xff] }
  0x64   :  { %515 = vmatpush.msrb.mxu3 %v347_v0  ;;  %v620_v0 = vld [vmem:[#allocation11 + $0x68] sm:$0xff] }
  0x65   :  { %501 = vmatpush.msrb.mxu2 %v303_v3  ;;  %v362_v3 = vld [vmem:[%s975_s4] sm:$0x3] }
  0x66   :  { %516 = vmatpush.msrb.mxu3 %v345_v2  ;;  %v618_v2 = vld [vmem:[#allocation11 + $0x58] sm:$0xff] }
  0x67   :  { %502 = vmatpush.msrb.mxu2 %v301_v5 }
  0x68   :  { %517 = vmatpush.msrb.mxu3 %v343_v4  ;;  %v617_v4 = vld [vmem:[#allocation11 + $0x50] sm:$0xff] }
  0x69   :  { %503 = vmatpush.msrb.mxu2 %v299_v8 }
  0x6a   :  { %518 = vmatpush.msrb.mxu3 %v341_v6  ;;  %v364_v6 = vperm.slane %v362_v3, 0 }
  0x6c   :  { %519 = vmatpush.msrb.mxu3 %v339_v9  ;;  %v615_v9 = vld [vmem:[#allocation11 + $0x40] sm:$0xff] }
  0x6e   :  { %520 = vmatpush.msrb.mxu3 %v337_v11 }
  0x70   :  { %521 = vmatpush.msrb.mxu3 %v335_v12  ;;  %v614_v12 = vld [vmem:[#allocation11 + $0x38] sm:$0xff] }
  0x72   :  { %522 = vmatpush.msrb.mxu3 %v333_v14  ;;  %v365_v14 = vperm.slane %v362_v3, 1 }
  0x74   :  { %523 = vmatpush.msrb.mxu3 %v331_v16 }
  0xa6   :  { %v167_v13 = vpop.f32.mrf.mxu3 }
  0xa7   :  { %v168_v15 = vadd.f32 %v167_v13, %v138_v10 }
  0xa9   :  { %v230_v17 = vmax.f32 %v168_v15, 0.0 }
  0xab   :  { %384 = vmatmul.f32.vlgmr.msra.gmra.mxu0 %v230_v17 }
  0xac   :  { %566 = vmatpush.msra.mxu0 %v545_v30  ;;  %v611_v30 = vld [vmem:[#allocation11 + $0x20] sm:$0xff] }
  0xae   :  { %v187_v19 = vpop.f32.mrf.mxu3  ;;  %567 = vmatpush.msra.mxu0 %v544_v31  ;;  %v610_v31 = vld [vmem:[#allocation11 + $0x18] sm:$0xff] }
  0xaf   :  { %v188_v20 = vadd.f32 %v187_v19, %v139_v18 }
  0xb0   :  { %568 = vmatpush.msra.mxu0 %v543_v32  ;;  %v609_v32 = vld [vmem:[#allocation11 + $0x10] sm:$0xff] }
  0xb1   :  { %v231_v21 = vmax.f32 %v188_v20, 0.0 }
  0xb2   :  { %569 = vmatpush.msra.mxu0 %v542_v33  ;;  %v608_v33 = vld [vmem:[#allocation11 + $0x8] sm:$0xff] }
  0xb3   :  { %404 = vmatmul.f32.vlgmr.msra.gmra.mxu1 %v231_v21  ;;  %464 = vmatmul.f32.vlgmr.msrb.gmra.mxu0 %v230_v17 }
  0xb4   :  { %586 = vmatpush.msra.mxu1 %v561_v35  ;;  %570 = vmatpush.msra.mxu0 %v541_v34  ;;  %v607_v34 = vld [vmem:[#allocation11] sm:$0xff]  ;;  %v686_v35 = vld [vmem:[%s977_s6] ss:$0 sm:$0xff] }
  0xb6   :  { %v207_v23 = vpop.f32.mrf.mxu3  ;;  %587 = vmatpush.msra.mxu1 %v560_v36  ;;  %571 = vmatpush.msra.mxu0 %v540_v37 }
  0xb7   :  { %v208_v24 = vadd.f32 %v207_v23, %v140_v22 }
  0xb8   :  { %572 = vmatpush.msra.mxu0 %v539_v38  ;;  %588 = vmatpush.msra.mxu1 %v559_v39 }
  0xb9   :  { %v232_v25 = vmax.f32 %v208_v24, 0.0 }
  0xba   :  { %573 = vmatpush.msra.mxu0 %v538_v40  ;;  %589 = vmatpush.msra.mxu1 %v558_v41  ;;  %v687_v41 = vld [vmem:[%s979_s8] ss:$0 sm:$0xff] }
  0xbb   :  { %424 = vmatmul.f32.vlgmr.msra.gmra.mxu2 %v232_v25  ;;  %484 = vmatmul.f32.vlgmr.msrb.gmra.mxu1 %v231_v21 }
  0xbc   :  { %574 = vmatpush.msra.mxu0 %v537_v42  ;;  %590 = vmatpush.msra.mxu1 %v557_v43 }
  0xbd   :  { %627 = vmatpush.msra.mxu2 %v622_v62 }
  0xbe   :  { %v227_v27 = vpop.f32.mrf.mxu3  ;;  %575 = vmatpush.msra.mxu0 %v536_v44  ;;  %591 = vmatpush.msra.mxu1 %v556_v45 }
  0xbf   :  { %v228_v28 = vadd.f32 %v227_v27, %v141_v26  ;;  %628 = vmatpush.msra.mxu2 %v621_v63 }
  0xc0   :  { %576 = vmatpush.msra.mxu0 %v535_v46  ;;  %592 = vmatpush.msra.mxu1 %v555_v47 }
  0xc1   :  { %v233_v29 = vmax.f32 %v228_v28, 0.0  ;;  %629 = vmatpush.msra.mxu2 %v620_v0  ;;  %v613_v28 = vld [vmem:[#allocation11 + $0x30] sm:$0xff] }
  0xc2   :  { %577 = vmatpush.msra.mxu0 %v534_v48  ;;  %593 = vmatpush.msra.mxu1 %v554_v49 }
  0xc3   :  { %444 = vmatmul.f32.vlgmr.msra.gmra.mxu3 %v233_v29  ;;  %504 = vmatmul.f32.vlgmr.msrb.gmra.mxu2 %v232_v25 }
  0xc4   :  { %578 = vmatpush.msra.mxu0 %v533_v50  ;;  %594 = vmatpush.msra.mxu1 %v553_v51 }
  0xc5   :  { %630 = vmatpush.msra.mxu2 %v619_v1 }
  0xc6   :  { %579 = vmatpush.msra.mxu0 %v532_v52  ;;  %595 = vmatpush.msra.mxu1 %v552_v53 }
  0xc7   :  { %631 = vmatpush.msra.mxu2 %v618_v2 }
  0xc8   :  { %580 = vmatpush.msra.mxu0 %v531_v54  ;;  %596 = vmatpush.msra.mxu1 %v551_v55 }
  0xc9   :  { %632 = vmatpush.msra.mxu2 %v617_v4 }
  0xca   :  { %581 = vmatpush.msra.mxu0 %v530_v56  ;;  %597 = vmatpush.msra.mxu1 %v550_v57 }
  0xcb   :  { %524 = vmatmul.f32.vlgmr.msrb.gmra.mxu3 %v233_v29  ;;  %633 = vmatpush.msra.mxu2 %v616_v7  ;;  %v612_v29 = vld [vmem:[#allocation11 + $0x28] sm:$0xff] }
  0xcc   :  { %598 = vmatpush.msra.mxu1 %v549_v58 }
  0xcd   :  { %634 = vmatpush.msra.mxu2 %v615_v9 }
  0xce   :  { %599 = vmatpush.msra.mxu1 %v548_v59 }
  0xcf   :  { %635 = vmatpush.msra.mxu2 %v614_v12 }
  0xd0   :  { %600 = vmatpush.msra.mxu1 %v547_v60 }
  0xd1   :  { %636 = vmatpush.msra.mxu2 %v613_v28 }
  0xd2   :  { %601 = vmatpush.msra.mxu1 %v546_v61 }
  0xd3   :  { %637 = vmatpush.msra.mxu2 %v612_v29 }
  0xd5   :  { %638 = vmatpush.msra.mxu2 %v611_v30 }
  0xd7   :  { %639 = vmatpush.msra.mxu2 %v610_v31 }
  0xd9   :  { %640 = vmatpush.msra.mxu2 %v609_v32 }
  0xdb   :  { %641 = vmatpush.msra.mxu2 %v608_v33 }
  0xdd   :  { %642 = vmatpush.msra.mxu2 %v607_v34 }
 0x128   :  { %v385_v5 = vpop.f32.mrf.mxu0 }
 0x129   :  { %v386_v11 = vadd.f32 %v385_v5, %v364_v6 }
 0x130   :  { %v405_v8 = vpop.f32.mrf.mxu1  ;;  %v465_v16 = vpop.f32.mrf.mxu0 }
 0x131   :  { %v406_v13 = vadd.f32 %v405_v8, %v386_v11  ;;  %v466_v20 = vadd.f32 %v465_v16, %v365_v14 }
 0x138   :  { %v485_v19 = vpop.f32.mrf.mxu1 }
 0x139   :  { %v486_v23 = vadd.f32 %v485_v19, %v466_v20 }
 0x13e   :  { %v425_v10 = vpop.f32.mrf.mxu2 }
 0x13f   :  { %v426_v15 = vadd.f32 %v425_v10, %v406_v13 }
 0x146   :  { %v445_v17 = vpop.f32.mrf.mxu3  ;;  %v505_v22 = vpop.f32.mrf.mxu2 }
 0x147   :  { %v446_v18 = vadd.f32 %v445_v17, %v426_v15  ;;  %v506_v24 = vadd.f32 %v505_v22, %v486_v23 }
 0x149   :  { %v528_v21 = vmax.f32 %v446_v18, 0.0 }
 0x14b   :  { %582 = vmatmul.f32.vlgmr.msra.gmra.mxu0 %v528_v21 }
 0x14e   :  { %v525_v25 = vpop.f32.mrf.mxu3 }
 0x14f   :  { %v526_v26 = vadd.f32 %v525_v25, %v506_v24 }
 0x151   :  { %v529_v27 = vmax.f32 %v526_v26, 0.0 }
 0x153   :  { %602 = vmatmul.f32.vlgmr.msra.gmra.mxu1 %v529_v27 }
 0x1c8   :  { %v583_v36 = vpop.f32.mrf.mxu0 }
 0x1c9   :  { %v584_v37 = vadd.f32 %v686_v35, %v583_v36 }
 0x1d0   :  { %v603_v38 = vpop.f32.mrf.mxu1 }
 0x1d1   :  { %v604_v39 = vadd.f32 %v603_v38, %v584_v37 }
 0x1d3   :  { %v606_v40 = vmax.f32 %v604_v39, 0.0 }
 0x1d5   :  { %643 = vmatmul.f32.vlgmr.msra.gmra.mxu2 %v606_v40 }
 0x258   :  { %v644_v42 = vpop.f32.mrf.mxu2 }
 0x259   :  { %v645_v43 = vadd.f32 %v687_v41, %v644_v42 }
 0x25b   :  { %688 = vtanh.f32 %v645_v43 }
 0x261   :  { %v689_v44 = vpop.eup %688 }
 0x262   :  { %648 = vst [vmem:[#allocation13] sm:$0xff] %v689_v44 }
 0x263   :  { %659 = dma.vmem_to_hbm [thread:$0]  %s655_s23, 128, %s657_s26, [#allocation4]  }
 0x264   :  { %866 = dma.done.wait [#allocation4], 128  }
 0x265   :  { %867 = vsyncadd [#allocation4], 4294967168 }
 0x266   :  { %664 = vsyncpa [#allocation3], 1 }
 0x267   :  { %665 = vsyncpa [#allocation6], 1 }
 0x268   :  { %666 = vsyncpa [#allocation9], 1 }
 0x269   :  { %667 = vsyncpa [#allocation12], 1 }
 0x26a   :  { %668 = vsyncpa [#allocation4], 1 }

</bundles_post_ra>
